<compile_context>
chip_gen: v7x
topology: tpu7x:2x2x1
jax: 0.10.0
libtpu: 0.0.40
codegen_flags: <defaults>
</compile_context>

<pallas_src>
import functools

import jax
import jax.numpy as jnp
import numpy as np
from jax.experimental import pallas as pl
from jax.experimental.pallas import tpu as pltpu

MIN_LOGSTD = -20.0
MAX_LOGSTD = 2.0

_LANE = 128   # TPU lane width; head / hidden feature dims padded to this.
_SUBLANE = 8  # f32 sublane height; batch tiles rounded to the dtype-packed multiple.


def _round_up(x, m):
    return (x + m - 1) // m * m


def vae_encoder_kernel(xa_ref, w1_ref, b1_ref, w2_ref, b2_ref, wh_ref, bh_ref,
                       out_ref, *, ls_off, latent):
    """One batch tile: 2-layer MLP + fused packed (mu | logstd) head.

    out_ref[:, :latent]              <- mu
    out_ref[:, ls_off:ls_off+latent] <- std = exp(clip(logstd))
    """
    # Layer 1: single fused matmul over concat(obs, action). MXU operands may be
    # bf16; accumulation and all elementwise math stay f32.
    h = jnp.dot(xa_ref[...], w1_ref[...], preferred_element_type=jnp.float32)
    h = jnp.maximum(h + b1_ref[...], 0.0)

    # Layer 2 (cast to the weight dtype only at the MXU boundary).
    h = jnp.dot(h.astype(w2_ref.dtype), w2_ref[...],
                preferred_element_type=jnp.float32)
    h = jnp.maximum(h + b2_ref[...], 0.0)

    # Fused heads: one MXU pass yields [mu | logstd] in one lane-dense slab.
    heads = jnp.dot(h.astype(wh_ref.dtype), wh_ref[...],
                    preferred_element_type=jnp.float32) + bh_ref[...]

    # clip+exp on the logstd lanes only, then ONE unmasked full-slab store.
    lane = jax.lax.broadcasted_iota(jnp.int32, heads.shape, dimension=1)
    is_logstd = (lane >= ls_off) & (lane < ls_off + latent)
    out_ref[...] = jnp.where(
        is_logstd, jnp.exp(jnp.clip(heads, MIN_LOGSTD, MAX_LOGSTD)), heads)


def pack_params(params, compute_dtype=jnp.bfloat16):
    """Pad / fuse PyTorch-layout params ([in, out] weights, [1, out] biases) into
    the kernel layout. Run once at load time, not per step.

    Returns (packed_params, meta). Weights are stored in `compute_dtype`
    (MXU operands); biases stay f32 (accumulator / elementwise path).
    """
    w1, b1, w2, b2, wmu, bmu, wls, bls = params
    hidden = w1.shape[1]
    latent = wmu.shape[1]
    hp = _round_up(hidden, _LANE)

    def pad2(a, rows, cols):
        return jnp.pad(a, ((0, rows - a.shape[0]), (0, cols - a.shape[1])))

    if 2 * latent <= _LANE:
        # Packed head: mu in lanes [0:L], logstd in [L:2L], remaining lanes zero.
        head_w, ls_off = _LANE, latent
        wh = jnp.zeros((hp, head_w), jnp.float32)
        wh = wh.at[:hidden, :latent].set(wmu)
        wh = wh.at[:hidden, latent:2 * latent].set(wls)
        bh = jnp.zeros((1, head_w), jnp.float32)
        bh = bh.at[:, :latent].set(bmu)
        bh = bh.at[:, latent:2 * latent].set(bls)
    else:
        # Wide head: mu in [0:lp], logstd in [lp:lp+latent].
        lp = _round_up(latent, _LANE)
        head_w, ls_off = 2 * lp, lp
        wh = jnp.concatenate([pad2(wmu, hp, lp), pad2(wls, hp, lp)], axis=1)
        bh = jnp.concatenate([pad2(bmu, 1, lp), pad2(bls, 1, lp)], axis=1)

    packed = (
        pad2(w1, w1.shape[0], hp).astype(compute_dtype),  # (obs+act, Hp) fused W1
        pad2(b1, 1, hp),                                  # f32 bias
        pad2(w2, hp, hp).astype(compute_dtype),
        pad2(b2, 1, hp),
        wh.astype(compute_dtype),
        bh,                                               # f32 bias
    )
    meta = dict(ls_off=ls_off, latent=latent, head_w=head_w,
                compute_dtype=compute_dtype)
    return packed, meta


def vae_encoder_forward(x, action, packed, meta, tile_b=2048):
    """Returns (mu, std): the Normal distribution parameters."""
    w1, b1, w2, b2, wh, bh = packed
    ls_off, latent, head_w = meta["ls_off"], meta["latent"], meta["head_w"]
    compute_dtype = meta["compute_dtype"]

    B = x.shape[0]
    # Fused first-layer input: concat in the wrapper (tiny; XLA fuses it) and
    # cast once so the batch-tile DMA is already in the MXU operand dtype.
    xa = jnp.concatenate([x, action], axis=1).astype(compute_dtype)
    in_dim = xa.shape[1]

    # Batch tiling. Per-grid-step overhead is ~0.35us, so use big tiles for
    # large B; for B <= tile_b split into >=2 sublane-aligned tiles so the
    # "parallel" batch axis can shard across v7x's two TensorCores.
    sub = _SUBLANE * max(1, 4 // jnp.dtype(compute_dtype).itemsize)
    if B > tile_b:
        tb = tile_b
    else:
        tb = _round_up(max(1, (B + 1) // 2), sub)
    bp = _round_up(B, tb)
    if bp != B:
        xa = jnp.pad(xa, ((0, bp - B), (0, 0)))

    const = lambda i: (0, 0)  # weights resident across the whole grid

    def call(single_buffer_weights):
        def wspec(shape):
            if single_buffer_weights:
                # Constant-index blocks need no double buffering; frees VMEM at
                # production hidden widths (matters most on v7x's 64 MiB VMEM).
                return pl.BlockSpec(shape, const, pipeline_mode=pl.Buffered(1))
            return pl.BlockSpec(shape, const)

        return pl.pallas_call(
            functools.partial(vae_encoder_kernel, ls_off=ls_off, latent=latent),
            out_shape=jax.ShapeDtypeStruct((bp, head_w), jnp.float32),
            grid=(bp // tb,),
            in_specs=[
                pl.BlockSpec((tb, in_dim), lambda i: (i, 0)),
                wspec(w1.shape), wspec(b1.shape), wspec(w2.shape),
                wspec(b2.shape), wspec(wh.shape), wspec(bh.shape),
            ],
            out_specs=pl.BlockSpec((tb, head_w), lambda i: (i, 0)),
            compiler_params=pltpu.CompilerParams(
                # batch axis is independent -> shard across TCs on v7x.
                dimension_semantics=("parallel",),
                vmem_limit_bytes=32 * 1024 * 1024,
            ),
        )(xa, w1, b1, w2, b2, wh, bh)

    try:
        out = call(True)
    except Exception:  # pl.Buffered / pipeline_mode unsupported on this jax build
        out = call(False)

    mu = out[:B, :latent]
    std = out[:B, ls_off:ls_off + latent]
    return mu, std


def init_params(key, obs_dim, action_dim, hidden_size, latent_size):
    """PyTorch nn.Linear-style uniform(-1/sqrt(fan_in), 1/sqrt(fan_in)) init.
    Weights stored transposed relative to PyTorch: [in, out]; biases [1, out]."""
    def linear(k, fan_in, fan_out):
        kw, kb = jax.random.split(k)
        bound = 1.0 / np.sqrt(fan_in)
        w = jax.random.uniform(kw, (fan_in, fan_out), jnp.float32, -bound, bound)
        b = jax.random.uniform(kb, (1, fan_out), jnp.float32, -bound, bound)
        return w, b

    k1, k2, k3, k4 = jax.random.split(key, 4)
    in_dim = obs_dim + action_dim
    w1, b1 = linear(k1, in_dim, hidden_size)
    w2, b2 = linear(k2, hidden_size, hidden_size)
    wmu, bmu = linear(k3, hidden_size, latent_size)
    wls, bls = linear(k4, hidden_size, latent_size)
    return (w1, b1, w2, b2, wmu, bmu, wls, bls)


def reference_forward(x, action, params):
    w1, b1, w2, b2, wmu, bmu, wls, bls = params
    h = jnp.concatenate([x, action], axis=-1)
    h = jnp.maximum(h @ w1 + b1, 0.0)
    h = jnp.maximum(h @ w2 + b2, 0.0)
    mu = h @ wmu + bmu
    logstd = jnp.clip(h @ wls + bls, MIN_LOGSTD, MAX_LOGSTD)
    return mu, jnp.exp(logstd)


if __name__ == "__main__":
    # small shapes: batch=8, obs_dim=16, action_dim=4, hidden=32, latent=8
    B, OBS, ACT, HID, LAT = 8, 16, 4, 32, 8

    key = jax.random.PRNGKey(0)
    kx, ka, kp = jax.random.split(key, 3)
    x = jax.random.normal(kx, (B, OBS), jnp.float32)
    action = jax.random.normal(ka, (B, ACT), jnp.float32)
    params = init_params(kp, OBS, ACT, HID, LAT)
    mu_ref, std_ref = reference_forward(x, action, params)

    # Production path: bf16 MXU operands, f32 accumulation / elementwise.
    packed_bf16, meta_bf16 = pack_params(params, compute_dtype=jnp.bfloat16)
    mu, std = vae_encoder_forward(x, action, packed_bf16, meta_bf16)
    jax.block_until_ready((mu, std))
    np.testing.assert_allclose(np.asarray(mu), np.asarray(mu_ref), rtol=5e-2, atol=5e-2)
    np.testing.assert_allclose(np.asarray(std), np.asarray(std_ref), rtol=5e-2, atol=5e-2)

    # f32 operand path: tight structural-correctness check of the same kernel.
    packed_f32, meta_f32 = pack_params(params, compute_dtype=jnp.float32)
    mu32, std32 = vae_encoder_forward(x, action, packed_f32, meta_f32)
    jax.block_until_ready((mu32, std32))
    np.testing.assert_allclose(np.asarray(mu32), np.asarray(mu_ref), rtol=1e-5, atol=1e-5)
    np.testing.assert_allclose(np.asarray(std32), np.asarray(std_ref), rtol=1e-5, atol=1e-5)

    print("KERNEL_OK")
</pallas_src>

<mosaic_0001>
module attributes {stable_mosaic.version = 11 : i64} {
  func.func @vae_encoder_kernel(%arg0: i32, %arg1: memref<16x20xbf16, #tpu.memory_space<vmem>>, %arg2: memref<20x128xbf16, #tpu.memory_space<vmem>>, %arg3: memref<1x128xf32, #tpu.memory_space<vmem>>, %arg4: memref<128x128xbf16, #tpu.memory_space<vmem>>, %arg5: memref<1x128xf32, #tpu.memory_space<vmem>>, %arg6: memref<128x128xbf16, #tpu.memory_space<vmem>>, %arg7: memref<1x128xf32, #tpu.memory_space<vmem>>, %arg8: memref<16x128xf32, #tpu.memory_space<vmem>>) attributes {dimension_semantics = [#tpu.dimension_semantics<parallel>], iteration_bounds = array<i64: 1>, scalar_prefetch = 0 : i64, scratch_operands = 0 : i64, tpu.core_type = #tpu.core_type<tc>, window_params = [{transform_indices = @transform_0, window_bounds = array<i64: 16, 20>}, {pipeline_mode = #tpu.pipeline_mode<synchronous>, transform_indices = @transform_1, window_bounds = array<i64: 20, 128>}, {pipeline_mode = #tpu.pipeline_mode<synchronous>, transform_indices = @transform_2, window_bounds = array<i64: 1, 128>}, {pipeline_mode = #tpu.pipeline_mode<synchronous>, transform_indices = @transform_3, window_bounds = array<i64: 128, 128>}, {pipeline_mode = #tpu.pipeline_mode<synchronous>, transform_indices = @transform_4, window_bounds = array<i64: 1, 128>}, {pipeline_mode = #tpu.pipeline_mode<synchronous>, transform_indices = @transform_5, window_bounds = array<i64: 128, 128>}, {pipeline_mode = #tpu.pipeline_mode<synchronous>, transform_indices = @transform_6, window_bounds = array<i64: 1, 128>}, {transform_indices = @transform_7, window_bounds = array<i64: 16, 128>}]} {
    %c0 = arith.constant 0 : index
    %c0_0 = arith.constant 0 : index
    %0 = vector.load %arg1[%c0, %c0_0] : memref<16x20xbf16, #tpu.memory_space<vmem>>, vector<16x20xbf16>
    %c0_1 = arith.constant 0 : index
    %c0_2 = arith.constant 0 : index
    %1 = vector.load %arg2[%c0_1, %c0_2] : memref<20x128xbf16, #tpu.memory_space<vmem>>, vector<20x128xbf16>
    %cst = arith.constant dense<0.000000e+00> : vector<16x128xf32>
    %2 = tpu.matmul %0, %1, %cst {dimension_numbers = #tpu.dot_dimension_numbers<[1], [0], [0], [1], [0, 0, 1, 1], [], []>} : vector<16x20xbf16>, vector<20x128xbf16>, vector<16x128xf32> -> vector<16x128xf32>
    %c0_3 = arith.constant 0 : index
    %c0_4 = arith.constant 0 : index
    %3 = vector.load %arg3[%c0_3, %c0_4] : memref<1x128xf32, #tpu.memory_space<vmem>>, vector<1x128xf32>
    %4 = vector.broadcast %3 : vector<1x128xf32> to vector<16x128xf32>
    %5 = arith.addf %2, %4 : vector<16x128xf32>
    %cst_5 = arith.constant 0.000000e+00 : f32
    %6 = vector.broadcast %cst_5 : f32 to vector<16x128xf32>
    %7 = arith.maximumf %5, %6 : vector<16x128xf32>
    %8 = arith.truncf %7 : vector<16x128xf32> to vector<16x128xbf16>
    %c0_6 = arith.constant 0 : index
    %c0_7 = arith.constant 0 : index
    %9 = vector.load %arg4[%c0_6, %c0_7] : memref<128x128xbf16, #tpu.memory_space<vmem>>, vector<128x128xbf16>
    %cst_8 = arith.constant dense<0.000000e+00> : vector<16x128xf32>
    %10 = tpu.matmul %8, %9, %cst_8 {dimension_numbers = #tpu.dot_dimension_numbers<[1], [0], [0], [1], [0, 0, 1, 1], [], []>} : vector<16x128xbf16>, vector<128x128xbf16>, vector<16x128xf32> -> vector<16x128xf32>
    %c0_9 = arith.constant 0 : index
    %c0_10 = arith.constant 0 : index
    %11 = vector.load %arg5[%c0_9, %c0_10] : memref<1x128xf32, #tpu.memory_space<vmem>>, vector<1x128xf32>
    %12 = vector.broadcast %11 : vector<1x128xf32> to vector<16x128xf32>
    %13 = arith.addf %10, %12 : vector<16x128xf32>
    %cst_11 = arith.constant 0.000000e+00 : f32
    %14 = vector.broadcast %cst_11 : f32 to vector<16x128xf32>
    %15 = arith.maximumf %13, %14 : vector<16x128xf32>
    %16 = arith.truncf %15 : vector<16x128xf32> to vector<16x128xbf16>
    %c0_12 = arith.constant 0 : index
    %c0_13 = arith.constant 0 : index
    %17 = vector.load %arg6[%c0_12, %c0_13] : memref<128x128xbf16, #tpu.memory_space<vmem>>, vector<128x128xbf16>
    %cst_14 = arith.constant dense<0.000000e+00> : vector<16x128xf32>
    %18 = tpu.matmul %16, %17, %cst_14 {dimension_numbers = #tpu.dot_dimension_numbers<[1], [0], [0], [1], [0, 0, 1, 1], [], []>} : vector<16x128xbf16>, vector<128x128xbf16>, vector<16x128xf32> -> vector<16x128xf32>
    %c0_15 = arith.constant 0 : index
    %c0_16 = arith.constant 0 : index
    %19 = vector.load %arg7[%c0_15, %c0_16] : memref<1x128xf32, #tpu.memory_space<vmem>>, vector<1x128xf32>
    %20 = vector.broadcast %19 : vector<1x128xf32> to vector<16x128xf32>
    %21 = arith.addf %18, %20 : vector<16x128xf32>
    %22 = tpu.iota {dimensions = array<i32: 1>} : vector<16x128xi32>
    %c8_i32 = arith.constant 8 : i32
    %23 = vector.broadcast %c8_i32 : i32 to vector<16x128xi32>
    %24 = arith.cmpi sge, %22, %23 : vector<16x128xi32>
    %c16_i32 = arith.constant 16 : i32
    %25 = vector.broadcast %c16_i32 : i32 to vector<16x128xi32>
    %26 = arith.cmpi slt, %22, %25 : vector<16x128xi32>
    %27 = arith.andi %24, %26 : vector<16x128xi1>
    %cst_17 = arith.constant -2.000000e+01 : f32
    %cst_18 = arith.constant 2.000000e+00 : f32
    %28 = vector.broadcast %cst_17 : f32 to vector<16x128xf32>
    %29 = arith.maximumf %28, %21 : vector<16x128xf32>
    %30 = vector.broadcast %cst_18 : f32 to vector<16x128xf32>
    %31 = arith.minimumf %30, %29 : vector<16x128xf32>
    %32 = math.exp %31 : vector<16x128xf32>
    %33 = arith.select %27, %32, %21 : vector<16x128xi1>, vector<16x128xf32>
    %c0_19 = arith.constant 0 : index
    %c0_20 = arith.constant 0 : index
    %34 = vector.load %arg8[%c0_19, %c0_20] : memref<16x128xf32, #tpu.memory_space<vmem>>, vector<16x128xf32>
    tpu.vector_store %arg8[%c0_19, %c0_20], %33 {strides = array<i32>} : memref<16x128xf32, #tpu.memory_space<vmem>>, vector<16x128xf32>,
    return
  }
  func.func @transform_0(%arg0: i32) -> (i32, i32) {
    %c0_i32 = arith.constant 0 : i32
    %c0_i32_0 = arith.constant 0 : i32
    return %arg0, %c0_i32 : i32, i32
  }
  func.func @transform_1(%arg0: i32) -> (i32, i32) {
    %c0_i32 = arith.constant 0 : i32
    %c0_i32_0 = arith.constant 0 : i32
    %c0_i32_1 = arith.constant 0 : i32
    return %c0_i32, %c0_i32_0 : i32, i32
  }
  func.func @transform_2(%arg0: i32) -> (i32, i32) {
    %c0_i32 = arith.constant 0 : i32
    %c0_i32_0 = arith.constant 0 : i32
    %c0_i32_1 = arith.constant 0 : i32
    return %c0_i32, %c0_i32_0 : i32, i32
  }
  func.func @transform_3(%arg0: i32) -> (i32, i32) {
    %c0_i32 = arith.constant 0 : i32
    %c0_i32_0 = arith.constant 0 : i32
    %c0_i32_1 = arith.constant 0 : i32
    return %c0_i32, %c0_i32_0 : i32, i32
  }
  func.func @transform_4(%arg0: i32) -> (i32, i32) {
    %c0_i32 = arith.constant 0 : i32
    %c0_i32_0 = arith.constant 0 : i32
    %c0_i32_1 = arith.constant 0 : i32
    return %c0_i32, %c0_i32_0 : i32, i32
  }
  func.func @transform_5(%arg0: i32) -> (i32, i32) {
    %c0_i32 = arith.constant 0 : i32
    %c0_i32_0 = arith.constant 0 : i32
    %c0_i32_1 = arith.constant 0 : i32
    return %c0_i32, %c0_i32_0 : i32, i32
  }
  func.func @transform_6(%arg0: i32) -> (i32, i32) {
    %c0_i32 = arith.constant 0 : i32
    %c0_i32_0 = arith.constant 0 : i32
    %c0_i32_1 = arith.constant 0 : i32
    return %c0_i32, %c0_i32_0 : i32, i32
  }
  func.func @transform_7(%arg0: i32) -> (i32, i32) {
    %c0_i32 = arith.constant 0 : i32
    %c0_i32_0 = arith.constant 0 : i32
    return %arg0, %c0_i32 : i32, i32
  }
}

module attributes {stable_mosaic.version = 11 : i64} {
  func.func @vae_encoder_kernel(%arg0: i32, %arg1: memref<16x20xbf16, #tpu.memory_space<vmem>>, %arg2: memref<20x128xbf16, #tpu.memory_space<vmem>>, %arg3: memref<1x128xf32, #tpu.memory_space<vmem>>, %arg4: memref<128x128xbf16, #tpu.memory_space<vmem>>, %arg5: memref<1x128xf32, #tpu.memory_space<vmem>>, %arg6: memref<128x128xbf16, #tpu.memory_space<vmem>>, %arg7: memref<1x128xf32, #tpu.memory_space<vmem>>, %arg8: memref<16x128xf32, #tpu.memory_space<vmem>>) attributes {dimension_semantics = [#tpu.dimension_semantics<parallel>], iteration_bounds = array<i64: 1>, scalar_prefetch = 0 : i64, scratch_operands = 0 : i64, tpu.core_type = #tpu.core_type<tc>, window_params = [{transform_indices = @transform_0, window_bounds = array<i64: 16, 20>}, {pipeline_mode = #tpu.pipeline_mode<synchronous>, transform_indices = @transform_1, window_bounds = array<i64: 20, 128>}, {pipeline_mode = #tpu.pipeline_mode<synchronous>, transform_indices = @transform_2, window_bounds = array<i64: 1, 128>}, {pipeline_mode = #tpu.pipeline_mode<synchronous>, transform_indices = @transform_3, window_bounds = array<i64: 128, 128>}, {pipeline_mode = #tpu.pipeline_mode<synchronous>, transform_indices = @transform_4, window_bounds = array<i64: 1, 128>}, {pipeline_mode = #tpu.pipeline_mode<synchronous>, transform_indices = @transform_5, window_bounds = array<i64: 128, 128>}, {pipeline_mode = #tpu.pipeline_mode<synchronous>, transform_indices = @transform_6, window_bounds = array<i64: 1, 128>}, {transform_indices = @transform_7, window_bounds = array<i64: 16, 128>}]} {
    %c0 = arith.constant 0 : index
    %c0_0 = arith.constant 0 : index
    %0 = vector.load %arg1[%c0, %c0_0] : memref<16x20xbf16, #tpu.memory_space<vmem>>, vector<16x20xbf16>
    %c0_1 = arith.constant 0 : index
    %c0_2 = arith.constant 0 : index
    %1 = vector.load %arg2[%c0_1, %c0_2] : memref<20x128xbf16, #tpu.memory_space<vmem>>, vector<20x128xbf16>
    %cst = arith.constant dense<0.000000e+00> : vector<16x128xf32>
    %2 = tpu.matmul %0, %1, %cst {dimension_numbers = #tpu.dot_dimension_numbers<[1], [0], [0], [1], [0, 0, 1, 1], [], []>} : vector<16x20xbf16>, vector<20x128xbf16>, vector<16x128xf32> -> vector<16x128xf32>
    %c0_3 = arith.constant 0 : index
    %c0_4 = arith.constant 0 : index
    %3 = vector.load %arg3[%c0_3, %c0_4] : memref<1x128xf32, #tpu.memory_space<vmem>>, vector<1x128xf32>
    %4 = vector.broadcast %3 : vector<1x128xf32> to vector<16x128xf32>
    %5 = arith.addf %2, %4 : vector<16x128xf32>
    %cst_5 = arith.constant 0.000000e+00 : f32
    %6 = vector.broadcast %cst_5 : f32 to vector<16x128xf32>
    %7 = arith.maximumf %5, %6 : vector<16x128xf32>
    %8 = arith.truncf %7 : vector<16x128xf32> to vector<16x128xbf16>
    %c0_6 = arith.constant 0 : index
    %c0_7 = arith.constant 0 : index
    %9 = vector.load %arg4[%c0_6, %c0_7] : memref<128x128xbf16, #tpu.memory_space<vmem>>, vector<128x128xbf16>
    %cst_8 = arith.constant dense<0.000000e+00> : vector<16x128xf32>
    %10 = tpu.matmul %8, %9, %cst_8 {dimension_numbers = #tpu.dot_dimension_numbers<[1], [0], [0], [1], [0, 0, 1, 1], [], []>} : vector<16x128xbf16>, vector<128x128xbf16>, vector<16x128xf32> -> vector<16x128xf32>
    %c0_9 = arith.constant 0 : index
    %c0_10 = arith.constant 0 : index
    %11 = vector.load %arg5[%c0_9, %c0_10] : memref<1x128xf32, #tpu.memory_space<vmem>>, vector<1x128xf32>
    %12 = vector.broadcast %11 : vector<1x128xf32> to vector<16x128xf32>
    %13 = arith.addf %10, %12 : vector<16x128xf32>
    %cst_11 = arith.constant 0.000000e+00 : f32
    %14 = vector.broadcast %cst_11 : f32 to vector<16x128xf32>
    %15 = arith.maximumf %13, %14 : vector<16x128xf32>
    %16 = arith.truncf %15 : vector<16x128xf32> to vector<16x128xbf16>
    %c0_12 = arith.constant 0 : index
    %c0_13 = arith.constant 0 : index
    %17 = vector.load %arg6[%c0_12, %c0_13] : memref<128x128xbf16, #tpu.memory_space<vmem>>, vector<128x128xbf16>
    %cst_14 = arith.constant dense<0.000000e+00> : vector<16x128xf32>
    %18 = tpu.matmul %16, %17, %cst_14 {dimension_numbers = #tpu.dot_dimension_numbers<[1], [0], [0], [1], [0, 0, 1, 1], [], []>} : vector<16x128xbf16>, vector<128x128xbf16>, vector<16x128xf32> -> vector<16x128xf32>
    %c0_15 = arith.constant 0 : index
    %c0_16 = arith.constant 0 : index
    %19 = vector.load %arg7[%c0_15, %c0_16] : memref<1x128xf32, #tpu.memory_space<vmem>>, vector<1x128xf32>
    %20 = vector.broadcast %19 : vector<1x128xf32> to vector<16x128xf32>
    %21 = arith.addf %18, %20 : vector<16x128xf32>
    %22 = tpu.iota {dimensions = array<i32: 1>} : vector<16x128xi32>
    %c8_i32 = arith.constant 8 : i32
    %23 = vector.broadcast %c8_i32 : i32 to vector<16x128xi32>
    %24 = arith.cmpi sge, %22, %23 : vector<16x128xi32>
    %c16_i32 = arith.constant 16 : i32
    %25 = vector.broadcast %c16_i32 : i32 to vector<16x128xi32>
    %26 = arith.cmpi slt, %22, %25 : vector<16x128xi32>
    %27 = arith.andi %24, %26 : vector<16x128xi1>
    %cst_17 = arith.constant -2.000000e+01 : f32
    %cst_18 = arith.constant 2.000000e+00 : f32
    %28 = vector.broadcast %cst_17 : f32 to vector<16x128xf32>
    %29 = arith.maximumf %28, %21 : vector<16x128xf32>
    %30 = vector.broadcast %cst_18 : f32 to vector<16x128xf32>
    %31 = arith.minimumf %30, %29 : vector<16x128xf32>
    %32 = math.exp %31 : vector<16x128xf32>
    %33 = arith.select %27, %32, %21 : vector<16x128xi1>, vector<16x128xf32>
    %c0_19 = arith.constant 0 : index
    %c0_20 = arith.constant 0 : index
    %34 = vector.load %arg8[%c0_19, %c0_20] : memref<16x128xf32, #tpu.memory_space<vmem>>, vector<16x128xf32>
    tpu.vector_store %arg8[%c0_19, %c0_20], %33 {strides = array<i32>} : memref<16x128xf32, #tpu.memory_space<vmem>>, vector<16x128xf32>,
    return
  }
  func.func @transform_0(%arg0: i32) -> (i32, i32) {
    %c0_i32 = arith.constant 0 : i32
    %c0_i32_0 = arith.constant 0 : i32
    return %arg0, %c0_i32 : i32, i32
  }
  func.func @transform_1(%arg0: i32) -> (i32, i32) {
    %c0_i32 = arith.constant 0 : i32
    %c0_i32_0 = arith.constant 0 : i32
    %c0_i32_1 = arith.constant 0 : i32
    return %c0_i32, %c0_i32_0 : i32, i32
  }
  func.func @transform_2(%arg0: i32) -> (i32, i32) {
    %c0_i32 = arith.constant 0 : i32
    %c0_i32_0 = arith.constant 0 : i32
    %c0_i32_1 = arith.constant 0 : i32
    return %c0_i32, %c0_i32_0 : i32, i32
  }
  func.func @transform_3(%arg0: i32) -> (i32, i32) {
    %c0_i32 = arith.constant 0 : i32
    %c0_i32_0 = arith.constant 0 : i32
    %c0_i32_1 = arith.constant 0 : i32
    return %c0_i32, %c0_i32_0 : i32, i32
  }
  func.func @transform_4(%arg0: i32) -> (i32, i32) {
    %c0_i32 = arith.constant 0 : i32
    %c0_i32_0 = arith.constant 0 : i32
    %c0_i32_1 = arith.constant 0 : i32
    return %c0_i32, %c0_i32_0 : i32, i32
  }
  func.func @transform_5(%arg0: i32) -> (i32, i32) {
    %c0_i32 = arith.constant 0 : i32
    %c0_i32_0 = arith.constant 0 : i32
    %c0_i32_1 = arith.constant 0 : i32
    return %c0_i32, %c0_i32_0 : i32, i32
  }
  func.func @transform_6(%arg0: i32) -> (i32, i32) {
    %c0_i32 = arith.constant 0 : i32
    %c0_i32_0 = arith.constant 0 : i32
    %c0_i32_1 = arith.constant 0 : i32
    return %c0_i32, %c0_i32_0 : i32, i32
  }
  func.func @transform_7(%arg0: i32) -> (i32, i32) {
    %c0_i32 = arith.constant 0 : i32
    %c0_i32_0 = arith.constant 0 : i32
    return %arg0, %c0_i32 : i32, i32
  }
}

</mosaic_0001>

<bundles_post_ra>
// kernel: tpu_custom_call.1
= control target key start
LH: loop header
LB: loop body
LE: loop exit
PB: predicated region body
PF: predicated region fallthrough
CT: control target
= control target key end

     0   :  { %12 = vsyncpa [#allocation3], 0  ;;  %s838_s0 = inlined_call_operand.hbm [shape: bf16[16,20], index: 0, kind: input, shape index: {}]   ;;  %s839_s1 = inlined_call_operand.hbm [shape: bf16[20,128], index: 1, kind: input, shape index: {}]   ;;  %s840_s2 = inlined_call_operand.vmem [shape: f32[1,128], index: 2, kind: input, shape index: {}]   ;;  %s841_s3 = inlined_call_operand.hbm [shape: bf16[128,128], index: 3, kind: input, shape index: {}]   ;;  %s842_s4 = inlined_call_operand.vmem [shape: f32[1,128], index: 4, kind: input, shape index: {}]   ;;  %s843_s5 = inlined_call_operand.hbm [shape: bf16[128,128], index: 5, kind: input, shape index: {}]   ;;  %s844_s6 = inlined_call_operand.vmem [shape: f32[1,128], index: 6, kind: input, shape index: {}]   ;;  %s845_s7 = inlined_call_operand.hbm [shape: f32[16,128], index: 7, kind: output, shape index: {}]  }
   0x1   :  { %13 = vsyncpa [#allocation6], 0 }
   0x2   :  { %14 = vsyncpa [#allocation9], 0 }
   0x3   :  { %15 = vsyncpa [#allocation4], 0  ;;  %s668_s24 = smov [#allocation5]   ;;  %s669_s26 = smov [#allocation2]  }
   0x4   :  { %s33_s25 = sshll.u32 %s668_s24, 4  ;;  %s21_s27 = sshll.u32 %s669_s26, 4  ;;  %s34_s25 = int_to_ptr.vmem [resolvable:$true] %s33_s25  ;;  %s719_s27 = int_to_ptr.vmem [resolvable:$true] %s21_s27 }
   0x5   :  { %s550_s30 = scalar_lea.hbm %s839_s1, 192 }
   0x6   :  { %p551_p0 = scmp.ne.s32.totalorder %s839_s1, %s550_s30  ;;  %p554_p1 = scmp.lt.u32.totalorder %s550_s30, %s839_s1 }
   0x8   :  { %p556_p2 = pnand %p554_p1, %p551_p0 }
   0xa   :  { %559 = shalt.err (!%p556_p2)
}
   0xb   :  { %s560_s12 = scalar_lea.vmem %s34_s25, 192  ;;  %p565_p4 = scmp.lt.s32.totalorder %s34_s25, %s34_s25 }
   0xc   :  { %p561_p3 = scmp.ne.s32.totalorder %s34_s25, %s560_s12  ;;  %p566_p5 = scmp.lt.s32.totalorder %s560_s12, %s560_s12 }
   0xe   :  { %p567_p6 = por %p566_p5, %p565_p4 }
  0x10   :  { %p568_p7 = pnand %p567_p6, %p561_p3 }
  0x12   :  { %571 = shalt.err (!%p568_p7)
}
  0x13   :  { %s670_s13 = smov 64   ;;  %s671_s14 = smov 4  }
  0x14   :  { %39 = dma.hbm_to_vmem [thread:$0]  %s839_s1, 192, %s34_s25, [#allocation6], %s670_s13, %s670_s13, %s671_s14  }
  0x15   :  { %s572_s19 = scalar_lea.hbm %s838_s0, 128 }
  0x16   :  { %p573_p8 = scmp.ne.s32.totalorder %s838_s0, %s572_s19  ;;  %p576_p9 = scmp.lt.u32.totalorder %s572_s19, %s838_s0 }
  0x18   :  { %p578_p10 = pnand %p576_p9, %p573_p8 }
  0x1a   :  { %581 = shalt.err (!%p578_p10)
}
  0x1b   :  { %s582_s24 = scalar_lea.vmem %s719_s27, 128  ;;  %p587_p12 = scmp.lt.s32.totalorder %s719_s27, %s719_s27 }
  0x1c   :  { %p583_p11 = scmp.ne.s32.totalorder %s719_s27, %s582_s24  ;;  %p588_p13 = scmp.lt.s32.totalorder %s582_s24, %s582_s24 }
  0x1e   :  { %p589_p0 = por %p588_p13, %p587_p12 }
  0x20   :  { %p590_p1 = pnand %p589_p0, %p583_p11 }
  0x22   :  { %593 = shalt.err (!%p590_p1)
}
  0x23   :  { %27 = dma.hbm_to_vmem [thread:$0]  %s838_s0, 128, %s719_s27, [#allocation3], %s670_s13, %s670_s13, %s671_s14  }
  0x24   :  { %s672_s26 = smov [#allocation7]   ;;  %s673_s29 = smov [#allocation8]  }
  0x25   :  { %s47_s28 = sshll.u32 %s672_s26, 4  ;;  %s61_s30 = sshll.u32 %s673_s29, 4  ;;  %s48_s28 = int_to_ptr.vmem [resolvable:$true] %s47_s28  ;;  %s756_s30 = int_to_ptr.vmem [resolvable:$true] %s61_s30 }
  0x26   :  { %s594_s10 = scalar_lea.hbm %s841_s3, 1024 }
  0x27   :  { %p595_p2 = scmp.ne.s32.totalorder %s841_s3, %s594_s10  ;;  %p598_p3 = scmp.lt.u32.totalorder %s594_s10, %s841_s3 }
  0x29   :  { %p600_p4 = pnand %p598_p3, %p595_p2 }
  0x2b   :  { %603 = shalt.err (!%p600_p4)
}
  0x2c   :  { %s604_s0 = scalar_lea.vmem %s48_s28, 1024  ;;  %p609_p6 = scmp.lt.s32.totalorder %s48_s28, %s48_s28 }
  0x2d   :  { %p605_p5 = scmp.ne.s32.totalorder %s48_s28, %s604_s0  ;;  %p610_p7 = scmp.lt.s32.totalorder %s604_s0, %s604_s0 }
  0x2f   :  { %p611_p8 = por %p610_p7, %p609_p6 }
  0x31   :  { %p612_p9 = pnand %p611_p8, %p605_p5 }
  0x33   :  { %615 = shalt.err (!%p612_p9)
}
  0x34   :  { %53 = dma.hbm_to_vmem [thread:$0]  %s841_s3, 1024, %s48_s28, [#allocation6], %s670_s13, %s670_s13, %s671_s14  }
  0x35   :  { %s616_s20 = scalar_lea.hbm %s843_s5, 1024 }
  0x36   :  { %p617_p10 = scmp.ne.s32.totalorder %s843_s5, %s616_s20  ;;  %p620_p11 = scmp.lt.u32.totalorder %s616_s20, %s843_s5 }
  0x38   :  { %p622_p12 = pnand %p620_p11, %p617_p10 }
  0x3a   :  { %625 = shalt.err (!%p622_p12)
}
  0x3b   :  { %s626_s1 = scalar_lea.vmem %s756_s30, 1024  ;;  %p631_p0 = scmp.lt.s32.totalorder %s756_s30, %s756_s30 }
  0x3c   :  { %p627_p13 = scmp.ne.s32.totalorder %s756_s30, %s626_s1  ;;  %p632_p1 = scmp.lt.s32.totalorder %s626_s1, %s626_s1 }
  0x3e   :  { %p633_p2 = por %p632_p1, %p631_p0 }
  0x40   :  { %p634_p3 = pnand %p633_p2, %p627_p13 }
  0x42   :  { %637 = shalt.err (!%p634_p3)
}
  0x43   :  { %67 = dma.hbm_to_vmem [thread:$0]  %s843_s5, 1024, %s756_s30, [#allocation9], %s670_s13, %s670_s13, %s671_s14  }
  0x44   :  { %660 = dma.done.wait [#allocation3], 128  }
  0x45   :  { %661 = vsyncadd [#allocation3], 4294967168 }
  0x46   :  { %662 = dma.done.wait [#allocation6], 1216  }
  0x47   :  { %663 = vsyncadd [#allocation6], 4294966080 }
  0x48   :  { %664 = dma.done.wait [#allocation9], 1024  }
  0x49   :  { %665 = vsyncadd [#allocation9], 4294966272  ;;  %v674_v0 = vmov 0.0   ;;  %vm675_vm0 = vmmov 0   ;;  %v527_v1 = vld [vmem:[#allocation5] sm:$0xff]   ;;  %vm113_vm1 = vcmask 1041408   ;;  %v388_v51 = vlaneseq }
  0x4a   :  { %468 = vmatprep.subr.bf16.mxu0 %v674_v0  ;;  %472 = vmatprep.mubr.msk.bf16.mxu0 %vm675_vm0, %v674_v0  ;;  %v528_v2 = vld [vmem:[#allocation5 + $0x8] ss:$0 sps:$4 sm:$0x33]   ;;  %v530_v4 = vld [vmem:[#allocation7] sm:$0xff]   ;;  %v529_v5 = vld [vmem:[#allocation2] sm:$0xff]   ;;  %vm109_vm2 = vcmask 162816  }
  0x4b   :  { %476 = vmatprep.subr.bf16.mxu1 %v674_v0  ;;  %492 = vmatprep.mubr.msk.bf16.mxu1 %vm675_vm0, %v674_v0  ;;  %v115_v3 = vsel %vm113_vm1, %v528_v2, 0  ;;  %v531_v6 = vld [vmem:[#allocation7 + $0x8] sm:$0xff]   ;;  %v532_v7 = vld [vmem:[#allocation7 + $0x10] sm:$0xff]   ;;  %v533_v8 = vld [vmem:[#allocation7 + $0x18] sm:$0xff]   ;;  %v389_v55 = vand.u32 127, %v388_v51 }
  0x4c   :  { %469 = vmatpush3.bf16.msra.mxu0 %v527_v1  ;;  %477 = vmatpush3.bf16.msra.mxu1 %v530_v4  ;;  %v534_v9 = vld [vmem:[#allocation7 + $0x20] sm:$0xff]   ;;  %v535_v10 = vld [vmem:[#allocation7 + $0x28] sm:$0xff]   ;;  %v536_v11 = vld [vmem:[#allocation7 + $0x30] sm:$0xff]  }
  0x4d   :  { %470 = vmatprep.subr.bf16.mxu0 %v674_v0  ;;  %478 = vmatprep.subr.bf16.mxu1 %v674_v0  ;;  %v537_v12 = vld [vmem:[#allocation7 + $0x38] sm:$0xff]   ;;  %v538_v13 = vld [vmem:[#allocation8] sm:$0xff]   ;;  %v539_v14 = vld [vmem:[#allocation8 + $0x8] sm:$0xff]   ;;  %vm390_vm3 = vcmp.ge.s32.totalorder %v389_v55, 8  ;;  %vm391_vm4 = vcmp.lt.s32.totalorder %v389_v55, 16 }
  0x4e   :  { %v540_v15 = vld [vmem:[#allocation8 + $0x10] sm:$0xff]   ;;  %v541_v16 = vld [vmem:[#allocation8 + $0x18] sm:$0xff]   ;;  %v542_v17 = vld [vmem:[#allocation8 + $0x20] sm:$0xff]  }
  0x4f   :  { %v543_v18 = vld [vmem:[#allocation8 + $0x28] sm:$0xff]   ;;  %v544_v29 = vld [vmem:[#allocation8 + $0x30] sm:$0xff]   ;;  %v545_v30 = vld [vmem:[#allocation8 + $0x38] sm:$0xff]  }
  0x50   :  { %471 = vmatpush3.bf16.msra.mxu0 %v115_v3  ;;  %479 = vmatpush3.bf16.msra.mxu1 %v531_v6  ;;  %v424_v19 = vld [vmem:[%s840_s2] ss:$0 sm:$0xff]  ;;  %vm392_vm5 = vmand %vm390_vm3, %vm391_vm4 }
  0x51   :  { %496 = vmatprep.subr.bf16.mxu0 %v674_v0  ;;  %480 = vmatprep.subr.bf16.mxu1 %v674_v0  ;;  %v429_v31 = vld [vmem:[%s842_s4] ss:$0 sm:$0xff]  ;;  %s676_s4 = smov [#allocation10]  }
  0x52   :  { %v438_v41 = vld [vmem:[%s844_s6] ss:$0 sm:$0xff]  ;;  %s410_s6 = sshll.u32 %s676_s4, 4  ;;  %s411_s6 = int_to_ptr.vmem [resolvable:$true] %s410_s6 }
  0x53   :  { %473 = vmatmul.mubr.msk.bf16.vlgmr.msra.gmra.mrb[0].mxu0 %vm109_vm2, %v529_v5  ;;  %s638_s29 = scalar_lea.vmem %s411_s6, 256  ;;  %p643_p5 = scmp.lt.s32.totalorder %s411_s6, %s411_s6 }
  0x54   :  { %512 = vmatprep.mubr.msk.bf16.mxu0 %vm675_vm0, %v674_v0  ;;  %481 = vmatpush3.bf16.msra.mxu1 %v532_v7  ;;  %p639_p4 = scmp.ne.s32.totalorder %s411_s6, %s638_s29  ;;  %p644_p6 = scmp.lt.s32.totalorder %s638_s29, %s638_s29 }
  0x55   :  { %482 = vmatprep.subr.bf16.mxu1 %v674_v0  ;;  %497 = vmatpush3.bf16.msra.mxu0 %v538_v13 }
  0x56   :  { %498 = vmatprep.subr.bf16.mxu0 %v674_v0  ;;  %p645_p7 = por %p644_p6, %p643_p5 }
  0x58   :  { %483 = vmatpush3.bf16.msra.mxu1 %v533_v8  ;;  %p646_p8 = pnand %p645_p7, %p639_p4 }
  0x59   :  { %484 = vmatprep.subr.bf16.mxu1 %v674_v0  ;;  %499 = vmatpush3.bf16.msra.mxu0 %v539_v14 }
  0x5a   :  { %500 = vmatprep.subr.bf16.mxu0 %v674_v0 }
  0x5c   :  { %485 = vmatpush3.bf16.msra.mxu1 %v534_v9 }
  0x5d   :  { %486 = vmatprep.subr.bf16.mxu1 %v674_v0  ;;  %501 = vmatpush3.bf16.msra.mxu0 %v540_v15 }
  0x5e   :  { %502 = vmatprep.subr.bf16.mxu0 %v674_v0 }
  0x60   :  { %487 = vmatpush3.bf16.msra.mxu1 %v535_v10 }
  0x61   :  { %488 = vmatprep.subr.bf16.mxu1 %v674_v0  ;;  %503 = vmatpush3.bf16.msra.mxu0 %v541_v16 }
  0x62   :  { %504 = vmatprep.subr.bf16.mxu0 %v674_v0 }
  0x64   :  { %489 = vmatpush3.bf16.msra.mxu1 %v536_v11 }
  0x65   :  { %490 = vmatprep.subr.bf16.mxu1 %v674_v0  ;;  %505 = vmatpush3.bf16.msra.mxu0 %v542_v17 }
  0x66   :  { %506 = vmatprep.subr.bf16.mxu0 %v674_v0 }
  0x68   :  { %491 = vmatpush3.bf16.msra.mxu1 %v537_v12 }
  0x69   :  { %507 = vmatpush3.bf16.msra.mxu0 %v543_v18 }
  0x6a   :  { %508 = vmatprep.subr.bf16.mxu0 %v674_v0 }
  0x6d   :  { %509 = vmatpush3.bf16.msra.mxu0 %v544_v29 }
  0x6e   :  { %510 = vmatprep.subr.bf16.mxu0 %v674_v0 }
  0x71   :  { %511 = vmatpush3.bf16.msra.mxu0 %v545_v30 }
 0x126   :  { %v151_v20 = vpop.f32.mrb[0].mxu0 }
 0x127   :  { %v152_v21 = vadd.f32 %v424_v19, %v151_v20  ;;  %v474_v22 = vpop.f32.mrb[1].mxu0 }
 0x128   :  { %v154_v23 = vpop.f32.mrb[2].mxu0 }
 0x129   :  { %v155_v24 = vadd.f32 %v424_v19, %v154_v23  ;;  %v475_v25 = vpop.f32.mrb[3].mxu0  ;;  %v158_v26 = vmax.f32 %v152_v21, 0.0 }
 0x12b   :  { %v159_v27 = vmax.f32 %v155_v24, 0.0 }
 0x12d   :  { %v160_v28 = vpack.c.bf16 %v159_v27, %v158_v26 }
 0x12f   :  { %493 = vmatmul.mubr.bf16.vlgmr.msra.gmra.mrb[0].mxu1 %v160_v28 }
 0x202   :  { %v266_v32 = vpop.f32.mrb[0].mxu1 }
 0x203   :  { %v267_v33 = vadd.f32 %v429_v31, %v266_v32  ;;  %v494_v34 = vpop.f32.mrb[1].mxu1 }
 0x204   :  { %v269_v35 = vpop.f32.mrb[2].mxu1 }
 0x205   :  { %v270_v36 = vadd.f32 %v429_v31, %v269_v35  ;;  %v495_v37 = vpop.f32.mrb[3].mxu1  ;;  %v273_v38 = vmax.f32 %v267_v33, 0.0 }
 0x207   :  { %v274_v39 = vmax.f32 %v270_v36, 0.0 }
 0x209   :  { %v275_v40 = vpack.c.bf16 %v274_v39, %v273_v38 }
 0x20b   :  { %513 = vmatmul.mubr.bf16.vlgmr.msra.gmra.mrb[4].mxu0 %v275_v40 }
 0x2de   :  { %v381_v42 = vpop.f32.mrb[4].mxu0 }
 0x2df   :  { %v382_v43 = vadd.f32 %v438_v41, %v381_v42  ;;  %v514_v44 = vpop.f32.mrb[5].mxu0 }
 0x2e0   :  { %v384_v45 = vpop.f32.mrb[6].mxu0 }
 0x2e1   :  { %v393_v46 = vmax.f32 %v382_v43, -20.0  ;;  %v385_v47 = vadd.f32 %v438_v41, %v384_v45  ;;  %v515_v48 = vpop.f32.mrb[7].mxu0 }
 0x2e3   :  { %v395_v49 = vmin.f32 %v393_v46, 2.0  ;;  %v394_v50 = vmax.f32 %v385_v47, -20.0 }
 0x2e5   :  { %v397_v52 = vmul.f32 1.442695, %v395_v49  ;;  %v396_v53 = vmin.f32 %v394_v50, 2.0 }
 0x2e7   :  { %546 = vpow2.f32 %v397_v52  ;;  %v399_v54 = vmul.f32 1.442695, %v396_v53 }
 0x2e9   :  { %548 = vpow2.f32 %v399_v54 }
 0x2f1   :  { %v547_v56 = vpop.eup %546 }
 0x2f2   :  { %v401_v57 = vsel %vm392_vm5, %v547_v56, %v382_v43 }
 0x2f3   :  { %v549_v58 = vpop.eup %548  ;;  %403 = vst [vmem:[#allocation10] sm:$0xff] %v401_v57 }
 0x2f4   :  { %v402_v59 = vsel %vm392_vm5, %v549_v58, %v385_v47 }
 0x2f5   :  { %404 = vst [vmem:[#allocation10 + $0x8] sm:$0xff] %v402_v59 }
 0x2f6   :  { %649 = shalt.err (!%p646_p8)
}
 0x2f7   :  { %s650_s9 = scalar_lea.hbm %s845_s7, 256 }
 0x2f8   :  { %p651_p9 = scmp.ne.s32.totalorder %s845_s7, %s650_s9  ;;  %p654_p10 = scmp.lt.u32.totalorder %s650_s9, %s845_s7 }
 0x2fa   :  { %p656_p11 = pnand %p654_p10, %p651_p9 }
 0x2fc   :  { %659 = shalt.err (!%p656_p11)
}
 0x2fd   :  { %s677_s16 = smov 128   ;;  %s678_s0 = smov 8  }
 0x2fe   :  { %416 = dma.vmem_to_hbm [thread:$0]  %s411_s6, 256, %s845_s7, [#allocation4], %s677_s16, %s677_s16, %s678_s0  }
 0x2ff   :  { %666 = dma.done.wait [#allocation4], 256  }
 0x300   :  { %667 = vsyncadd [#allocation4], 4294967040 }
 0x301   :  { %420 = vsyncpa [#allocation3], 1 }
 0x302   :  { %421 = vsyncpa [#allocation6], 1 }
 0x303   :  { %422 = vsyncpa [#allocation9], 1 }
 0x304   :  { %423 = vsyncpa [#allocation4], 1 }

// kernel: tpu_custom_call.1
= control target key start
LH: loop header
LB: loop body
LE: loop exit
PB: predicated region body
PF: predicated region fallthrough
CT: control target
= control target key end

     0   :  { %12 = vsyncpa [#allocation3], 0  ;;  %s838_s0 = inlined_call_operand.hbm [shape: bf16[16,20], index: 0, kind: input, shape index: {}]   ;;  %s839_s1 = inlined_call_operand.hbm [shape: bf16[20,128], index: 1, kind: input, shape index: {}]   ;;  %s840_s2 = inlined_call_operand.vmem [shape: f32[1,128], index: 2, kind: input, shape index: {}]   ;;  %s841_s3 = inlined_call_operand.hbm [shape: bf16[128,128], index: 3, kind: input, shape index: {}]   ;;  %s842_s4 = inlined_call_operand.vmem [shape: f32[1,128], index: 4, kind: input, shape index: {}]   ;;  %s843_s5 = inlined_call_operand.hbm [shape: bf16[128,128], index: 5, kind: input, shape index: {}]   ;;  %s844_s6 = inlined_call_operand.vmem [shape: f32[1,128], index: 6, kind: input, shape index: {}]   ;;  %s845_s7 = inlined_call_operand.hbm [shape: f32[16,128], index: 7, kind: output, shape index: {}]  }
   0x1   :  { %13 = vsyncpa [#allocation6], 0 }
   0x2   :  { %14 = vsyncpa [#allocation9], 0 }
   0x3   :  { %15 = vsyncpa [#allocation4], 0  ;;  %s668_s24 = smov [#allocation5]   ;;  %s669_s26 = smov [#allocation2]  }
   0x4   :  { %s33_s25 = sshll.u32 %s668_s24, 4  ;;  %s21_s27 = sshll.u32 %s669_s26, 4  ;;  %s34_s25 = int_to_ptr.vmem [resolvable:$true] %s33_s25  ;;  %s719_s27 = int_to_ptr.vmem [resolvable:$true] %s21_s27 }
   0x5   :  { %s550_s30 = scalar_lea.hbm %s839_s1, 192 }
   0x6   :  { %p551_p0 = scmp.ne.s32.totalorder %s839_s1, %s550_s30  ;;  %p554_p1 = scmp.lt.u32.totalorder %s550_s30, %s839_s1 }
   0x8   :  { %p556_p2 = pnand %p554_p1, %p551_p0 }
   0xa   :  { %559 = shalt.err (!%p556_p2)
}
   0xb   :  { %s560_s12 = scalar_lea.vmem %s34_s25, 192  ;;  %p565_p4 = scmp.lt.s32.totalorder %s34_s25, %s34_s25 }
   0xc   :  { %p561_p3 = scmp.ne.s32.totalorder %s34_s25, %s560_s12  ;;  %p566_p5 = scmp.lt.s32.totalorder %s560_s12, %s560_s12 }
   0xe   :  { %p567_p6 = por %p566_p5, %p565_p4 }
  0x10   :  { %p568_p7 = pnand %p567_p6, %p561_p3 }
  0x12   :  { %571 = shalt.err (!%p568_p7)
}
  0x13   :  { %s670_s13 = smov 64   ;;  %s671_s14 = smov 4  }
  0x14   :  { %39 = dma.hbm_to_vmem [thread:$0]  %s839_s1, 192, %s34_s25, [#allocation6], %s670_s13, %s670_s13, %s671_s14  }
  0x15   :  { %s572_s19 = scalar_lea.hbm %s838_s0, 128 }
  0x16   :  { %p573_p8 = scmp.ne.s32.totalorder %s838_s0, %s572_s19  ;;  %p576_p9 = scmp.lt.u32.totalorder %s572_s19, %s838_s0 }
  0x18   :  { %p578_p10 = pnand %p576_p9, %p573_p8 }
  0x1a   :  { %581 = shalt.err (!%p578_p10)
}
  0x1b   :  { %s582_s24 = scalar_lea.vmem %s719_s27, 128  ;;  %p587_p12 = scmp.lt.s32.totalorder %s719_s27, %s719_s27 }
  0x1c   :  { %p583_p11 = scmp.ne.s32.totalorder %s719_s27, %s582_s24  ;;  %p588_p13 = scmp.lt.s32.totalorder %s582_s24, %s582_s24 }
  0x1e   :  { %p589_p0 = por %p588_p13, %p587_p12 }
  0x20   :  { %p590_p1 = pnand %p589_p0, %p583_p11 }
  0x22   :  { %593 = shalt.err (!%p590_p1)
}
  0x23   :  { %27 = dma.hbm_to_vmem [thread:$0]  %s838_s0, 128, %s719_s27, [#allocation3], %s670_s13, %s670_s13, %s671_s14  }
  0x24   :  { %s672_s26 = smov [#allocation7]   ;;  %s673_s29 = smov [#allocation8]  }
  0x25   :  { %s47_s28 = sshll.u32 %s672_s26, 4  ;;  %s61_s30 = sshll.u32 %s673_s29, 4  ;;  %s48_s28 = int_to_ptr.vmem [resolvable:$true] %s47_s28  ;;  %s756_s30 = int_to_ptr.vmem [resolvable:$true] %s61_s30 }
  0x26   :  { %s594_s10 = scalar_lea.hbm %s841_s3, 1024 }
  0x27   :  { %p595_p2 = scmp.ne.s32.totalorder %s841_s3, %s594_s10  ;;  %p598_p3 = scmp.lt.u32.totalorder %s594_s10, %s841_s3 }
  0x29   :  { %p600_p4 = pnand %p598_p3, %p595_p2 }
  0x2b   :  { %603 = shalt.err (!%p600_p4)
}
  0x2c   :  { %s604_s0 = scalar_lea.vmem %s48_s28, 1024  ;;  %p609_p6 = scmp.lt.s32.totalorder %s48_s28, %s48_s28 }
  0x2d   :  { %p605_p5 = scmp.ne.s32.totalorder %s48_s28, %s604_s0  ;;  %p610_p7 = scmp.lt.s32.totalorder %s604_s0, %s604_s0 }
  0x2f   :  { %p611_p8 = por %p610_p7, %p609_p6 }
  0x31   :  { %p612_p9 = pnand %p611_p8, %p605_p5 }
  0x33   :  { %615 = shalt.err (!%p612_p9)
}
  0x34   :  { %53 = dma.hbm_to_vmem [thread:$0]  %s841_s3, 1024, %s48_s28, [#allocation6], %s670_s13, %s670_s13, %s671_s14  }
  0x35   :  { %s616_s20 = scalar_lea.hbm %s843_s5, 1024 }
  0x36   :  { %p617_p10 = scmp.ne.s32.totalorder %s843_s5, %s616_s20  ;;  %p620_p11 = scmp.lt.u32.totalorder %s616_s20, %s843_s5 }
  0x38   :  { %p622_p12 = pnand %p620_p11, %p617_p10 }
  0x3a   :  { %625 = shalt.err (!%p622_p12)
}
  0x3b   :  { %s626_s1 = scalar_lea.vmem %s756_s30, 1024  ;;  %p631_p0 = scmp.lt.s32.totalorder %s756_s30, %s756_s30 }
  0x3c   :  { %p627_p13 = scmp.ne.s32.totalorder %s756_s30, %s626_s1  ;;  %p632_p1 = scmp.lt.s32.totalorder %s626_s1, %s626_s1 }
  0x3e   :  { %p633_p2 = por %p632_p1, %p631_p0 }
  0x40   :  { %p634_p3 = pnand %p633_p2, %p627_p13 }
  0x42   :  { %637 = shalt.err (!%p634_p3)
}
  0x43   :  { %67 = dma.hbm_to_vmem [thread:$0]  %s843_s5, 1024, %s756_s30, [#allocation9], %s670_s13, %s670_s13, %s671_s14  }
  0x44   :  { %660 = dma.done.wait [#allocation3], 128  }
  0x45   :  { %661 = vsyncadd [#allocation3], 4294967168 }
  0x46   :  { %662 = dma.done.wait [#allocation6], 1216  }
  0x47   :  { %663 = vsyncadd [#allocation6], 4294966080 }
  0x48   :  { %664 = dma.done.wait [#allocation9], 1024  }
  0x49   :  { %665 = vsyncadd [#allocation9], 4294966272  ;;  %v674_v0 = vmov 0.0   ;;  %vm675_vm0 = vmmov 0   ;;  %v527_v1 = vld [vmem:[#allocation5] sm:$0xff]   ;;  %vm113_vm1 = vcmask 1041408   ;;  %v388_v51 = vlaneseq }
  0x4a   :  { %468 = vmatprep.subr.bf16.mxu0 %v674_v0  ;;  %472 = vmatprep.mubr.msk.bf16.mxu0 %vm675_vm0, %v674_v0  ;;  %v528_v2 = vld [vmem:[#allocation5 + $0x8] ss:$0 sps:$4 sm:$0x33]   ;;  %v530_v4 = vld [vmem:[#allocation7] sm:$0xff]   ;;  %v529_v5 = vld [vmem:[#allocation2] sm:$0xff]   ;;  %vm109_vm2 = vcmask 162816  }
  0x4b   :  { %476 = vmatprep.subr.bf16.mxu1 %v674_v0  ;;  %492 = vmatprep.mubr.msk.bf16.mxu1 %vm675_vm0, %v674_v0  ;;  %v115_v3 = vsel %vm113_vm1, %v528_v2, 0  ;;  %v531_v6 = vld [vmem:[#allocation7 + $0x8] sm:$0xff]   ;;  %v532_v7 = vld [vmem:[#allocation7 + $0x10] sm:$0xff]   ;;  %v533_v8 = vld [vmem:[#allocation7 + $0x18] sm:$0xff]   ;;  %v389_v55 = vand.u32 127, %v388_v51 }
  0x4c   :  { %469 = vmatpush3.bf16.msra.mxu0 %v527_v1  ;;  %477 = vmatpush3.bf16.msra.mxu1 %v530_v4  ;;  %v534_v9 = vld [vmem:[#allocation7 + $0x20] sm:$0xff]   ;;  %v535_v10 = vld [vmem:[#allocation7 + $0x28] sm:$0xff]   ;;  %v536_v11 = vld [vmem:[#allocation7 + $0x30] sm:$0xff]  }
  0x4d   :  { %470 = vmatprep.subr.bf16.mxu0 %v674_v0  ;;  %478 = vmatprep.subr.bf16.mxu1 %v674_v0  ;;  %v537_v12 = vld [vmem:[#allocation7 + $0x38] sm:$0xff]   ;;  %v538_v13 = vld [vmem:[#allocation8] sm:$0xff]   ;;  %v539_v14 = vld [vmem:[#allocation8 + $0x8] sm:$0xff]   ;;  %vm390_vm3 = vcmp.ge.s32.totalorder %v389_v55, 8  ;;  %vm391_vm4 = vcmp.lt.s32.totalorder %v389_v55, 16 }
  0x4e   :  { %v540_v15 = vld [vmem:[#allocation8 + $0x10] sm:$0xff]   ;;  %v541_v16 = vld [vmem:[#allocation8 + $0x18] sm:$0xff]   ;;  %v542_v17 = vld [vmem:[#allocation8 + $0x20] sm:$0xff]  }
  0x4f   :  { %v543_v18 = vld [vmem:[#allocation8 + $0x28] sm:$0xff]   ;;  %v544_v29 = vld [vmem:[#allocation8 + $0x30] sm:$0xff]   ;;  %v545_v30 = vld [vmem:[#allocation8 + $0x38] sm:$0xff]  }
  0x50   :  { %471 = vmatpush3.bf16.msra.mxu0 %v115_v3  ;;  %479 = vmatpush3.bf16.msra.mxu1 %v531_v6  ;;  %v424_v19 = vld [vmem:[%s840_s2] ss:$0 sm:$0xff]  ;;  %vm392_vm5 = vmand %vm390_vm3, %vm391_vm4 }
  0x51   :  { %496 = vmatprep.subr.bf16.mxu0 %v674_v0  ;;  %480 = vmatprep.subr.bf16.mxu1 %v674_v0  ;;  %v429_v31 = vld [vmem:[%s842_s4] ss:$0 sm:$0xff]  ;;  %s676_s4 = smov [#allocation10]  }
  0x52   :  { %v438_v41 = vld [vmem:[%s844_s6] ss:$0 sm:$0xff]  ;;  %s410_s6 = sshll.u32 %s676_s4, 4  ;;  %s411_s6 = int_to_ptr.vmem [resolvable:$true] %s410_s6 }
  0x53   :  { %473 = vmatmul.mubr.msk.bf16.vlgmr.msra.gmra.mrb[0].mxu0 %vm109_vm2, %v529_v5  ;;  %s638_s29 = scalar_lea.vmem %s411_s6, 256  ;;  %p643_p5 = scmp.lt.s32.totalorder %s411_s6, %s411_s6 }
  0x54   :  { %512 = vmatprep.mubr.msk.bf16.mxu0 %vm675_vm0, %v674_v0  ;;  %481 = vmatpush3.bf16.msra.mxu1 %v532_v7  ;;  %p639_p4 = scmp.ne.s32.totalorder %s411_s6, %s638_s29  ;;  %p644_p6 = scmp.lt.s32.totalorder %s638_s29, %s638_s29 }
  0x55   :  { %482 = vmatprep.subr.bf16.mxu1 %v674_v0  ;;  %497 = vmatpush3.bf16.msra.mxu0 %v538_v13 }
  0x56   :  { %498 = vmatprep.subr.bf16.mxu0 %v674_v0  ;;  %p645_p7 = por %p644_p6, %p643_p5 }
  0x58   :  { %483 = vmatpush3.bf16.msra.mxu1 %v533_v8  ;;  %p646_p8 = pnand %p645_p7, %p639_p4 }
  0x59   :  { %484 = vmatprep.subr.bf16.mxu1 %v674_v0  ;;  %499 = vmatpush3.bf16.msra.mxu0 %v539_v14 }
  0x5a   :  { %500 = vmatprep.subr.bf16.mxu0 %v674_v0 }
  0x5c   :  { %485 = vmatpush3.bf16.msra.mxu1 %v534_v9 }
  0x5d   :  { %486 = vmatprep.subr.bf16.mxu1 %v674_v0  ;;  %501 = vmatpush3.bf16.msra.mxu0 %v540_v15 }
  0x5e   :  { %502 = vmatprep.subr.bf16.mxu0 %v674_v0 }
  0x60   :  { %487 = vmatpush3.bf16.msra.mxu1 %v535_v10 }
  0x61   :  { %488 = vmatprep.subr.bf16.mxu1 %v674_v0  ;;  %503 = vmatpush3.bf16.msra.mxu0 %v541_v16 }
  0x62   :  { %504 = vmatprep.subr.bf16.mxu0 %v674_v0 }
  0x64   :  { %489 = vmatpush3.bf16.msra.mxu1 %v536_v11 }
  0x65   :  { %490 = vmatprep.subr.bf16.mxu1 %v674_v0  ;;  %505 = vmatpush3.bf16.msra.mxu0 %v542_v17 }
  0x66   :  { %506 = vmatprep.subr.bf16.mxu0 %v674_v0 }
  0x68   :  { %491 = vmatpush3.bf16.msra.mxu1 %v537_v12 }
  0x69   :  { %507 = vmatpush3.bf16.msra.mxu0 %v543_v18 }
  0x6a   :  { %508 = vmatprep.subr.bf16.mxu0 %v674_v0 }
  0x6d   :  { %509 = vmatpush3.bf16.msra.mxu0 %v544_v29 }
  0x6e   :  { %510 = vmatprep.subr.bf16.mxu0 %v674_v0 }
  0x71   :  { %511 = vmatpush3.bf16.msra.mxu0 %v545_v30 }
 0x126   :  { %v151_v20 = vpop.f32.mrb[0].mxu0 }
 0x127   :  { %v152_v21 = vadd.f32 %v424_v19, %v151_v20  ;;  %v474_v22 = vpop.f32.mrb[1].mxu0 }
 0x128   :  { %v154_v23 = vpop.f32.mrb[2].mxu0 }
 0x129   :  { %v155_v24 = vadd.f32 %v424_v19, %v154_v23  ;;  %v475_v25 = vpop.f32.mrb[3].mxu0  ;;  %v158_v26 = vmax.f32 %v152_v21, 0.0 }
 0x12b   :  { %v159_v27 = vmax.f32 %v155_v24, 0.0 }
 0x12d   :  { %v160_v28 = vpack.c.bf16 %v159_v27, %v158_v26 }
 0x12f   :  { %493 = vmatmul.mubr.bf16.vlgmr.msra.gmra.mrb[0].mxu1 %v160_v28 }
 0x202   :  { %v266_v32 = vpop.f32.mrb[0].mxu1 }
 0x203   :  { %v267_v33 = vadd.f32 %v429_v31, %v266_v32  ;;  %v494_v34 = vpop.f32.mrb[1].mxu1 }
 0x204   :  { %v269_v35 = vpop.f32.mrb[2].mxu1 }
 0x205   :  { %v270_v36 = vadd.f32 %v429_v31, %v269_v35  ;;  %v495_v37 = vpop.f32.mrb[3].mxu1  ;;  %v273_v38 = vmax.f32 %v267_v33, 0.0 }
 0x207   :  { %v274_v39 = vmax.f32 %v270_v36, 0.0 }
 0x209   :  { %v275_v40 = vpack.c.bf16 %v274_v39, %v273_v38 }
 0x20b   :  { %513 = vmatmul.mubr.bf16.vlgmr.msra.gmra.mrb[4].mxu0 %v275_v40 }
 0x2de   :  { %v381_v42 = vpop.f32.mrb[4].mxu0 }
 0x2df   :  { %v382_v43 = vadd.f32 %v438_v41, %v381_v42  ;;  %v514_v44 = vpop.f32.mrb[5].mxu0 }
 0x2e0   :  { %v384_v45 = vpop.f32.mrb[6].mxu0 }
 0x2e1   :  { %v393_v46 = vmax.f32 %v382_v43, -20.0  ;;  %v385_v47 = vadd.f32 %v438_v41, %v384_v45  ;;  %v515_v48 = vpop.f32.mrb[7].mxu0 }
 0x2e3   :  { %v395_v49 = vmin.f32 %v393_v46, 2.0  ;;  %v394_v50 = vmax.f32 %v385_v47, -20.0 }
 0x2e5   :  { %v397_v52 = vmul.f32 1.442695, %v395_v49  ;;  %v396_v53 = vmin.f32 %v394_v50, 2.0 }
 0x2e7   :  { %546 = vpow2.f32 %v397_v52  ;;  %v399_v54 = vmul.f32 1.442695, %v396_v53 }
 0x2e9   :  { %548 = vpow2.f32 %v399_v54 }
 0x2f1   :  { %v547_v56 = vpop.eup %546 }
 0x2f2   :  { %v401_v57 = vsel %vm392_vm5, %v547_v56, %v382_v43 }
 0x2f3   :  { %v549_v58 = vpop.eup %548  ;;  %403 = vst [vmem:[#allocation10] sm:$0xff] %v401_v57 }
 0x2f4   :  { %v402_v59 = vsel %vm392_vm5, %v549_v58, %v385_v47 }
 0x2f5   :  { %404 = vst [vmem:[#allocation10 + $0x8] sm:$0xff] %v402_v59 }
 0x2f6   :  { %649 = shalt.err (!%p646_p8)
}
 0x2f7   :  { %s650_s9 = scalar_lea.hbm %s845_s7, 256 }
 0x2f8   :  { %p651_p9 = scmp.ne.s32.totalorder %s845_s7, %s650_s9  ;;  %p654_p10 = scmp.lt.u32.totalorder %s650_s9, %s845_s7 }
 0x2fa   :  { %p656_p11 = pnand %p654_p10, %p651_p9 }
 0x2fc   :  { %659 = shalt.err (!%p656_p11)
}
 0x2fd   :  { %s677_s16 = smov 128   ;;  %s678_s0 = smov 8  }
 0x2fe   :  { %416 = dma.vmem_to_hbm [thread:$0]  %s411_s6, 256, %s845_s7, [#allocation4], %s677_s16, %s677_s16, %s678_s0  }
 0x2ff   :  { %666 = dma.done.wait [#allocation4], 256  }
 0x300   :  { %667 = vsyncadd [#allocation4], 4294967040 }
 0x301   :  { %420 = vsyncpa [#allocation3], 1 }
 0x302   :  { %421 = vsyncpa [#allocation6], 1 }
 0x303   :  { %422 = vsyncpa [#allocation9], 1 }
 0x304   :  { %423 = vsyncpa [#allocation4], 1 }

</bundles_post_ra>
